<compile_context>
chip_gen: v5e
topology: v5e:2x2
jax: 0.10.0
libtpu: 0.0.40
codegen_flags: <defaults>
</compile_context>

<pallas_src>
import functools
import math

import jax
import jax.numpy as jnp
from jax.experimental import pallas as pl
from jax.experimental.pallas import tpu as pltpu

_NEG_FILL = -1000000.0


def _hopfield_energy_kernel(g_ref, w_ref, mask_ref, out_ref, *,
                            fn_name, total_rows, tile_m, need_row_mask):
    # MXU projection of this row tile: (tile_m, K) @ (K, N) -> f32 scores.
    scores = jnp.dot(g_ref[...], w_ref[...], preferred_element_type=jnp.float32)

    # Masked fill: scores[~mask] = -1e6 (mask passed as int8, 1 = keep).
    scores = jnp.where(mask_ref[...] != 0, scores, jnp.float32(_NEG_FILL))

    # Per-row energy (tile_m, 1) so a ragged last block can be masked row-wise.
    if fn_name == "relu":
        r = jnp.maximum(scores, 0.0)
        row_e = -0.5 * jnp.sum(r * r, axis=-1, keepdims=True)
    elif fn_name == "softmax":
        mmax = jnp.max(scores, axis=-1, keepdims=True)
        row_e = -(mmax + jnp.log(
            jnp.sum(jnp.exp(scores - mmax), axis=-1, keepdims=True)))
    elif fn_name == "tanh":
        row_e = -jnp.sum(jnp.log(jnp.cosh(scores)), axis=-1, keepdims=True)
    else:
        raise NotImplementedError(fn_name)

    # Zero out rows past the true end of the array (ragged last grid step).
    # Only emitted when tile_m does not divide the row count.
    if need_row_mask:
        i = pl.program_id(0)
        row_idx = i * tile_m + jax.lax.broadcasted_iota(jnp.int32, row_e.shape, 0)
        row_e = jnp.where(row_idx < total_rows, row_e, jnp.float32(0.0))

    # One scalar partial energy per tile; wrapper sums the partials.
    out_ref[...] = jnp.broadcast_to(jnp.sum(row_e), (1, 1, 1))


def _pick_tile_m(m_rows, k_dim, n_dim):
    """Largest row tile that keeps all operands inside a conservative VMEM budget."""
    # Resident weight block is double-buffered by the pipeline.
    weight_bytes = 2 * k_dim * n_dim * 4
    budget = 28 * 1024 * 1024 - weight_bytes      # fits v5e/v6e/v7x scoped VMEM
    budget = max(budget, 2 * 1024 * 1024)
    # Per extra row: g f32 x2 buffers + mask i8 x2 buffers + ~2 f32 score temps.
    per_row = 2 * 4 * k_dim + 2 * n_dim + 8 * n_dim
    tile_m = budget // max(per_row, 1)
    tile_m = max(32, min(2048, (tile_m // 32) * 32))  # 32-row align (int8 mask packing)
    if m_rows <= tile_m:
        return m_rows  # single full block (full-dim block is always legal)
    return tile_m


def hopfield_forward(g, weight, mask, fn="relu"):
    """Pallas equivalent of Hopfield.forward.

    g:      (..., in_dim)       float
    weight: (out_dim, in_dim)   torch nn.Linear layout (bias=False)
    mask:   (..., out_dim)      bool, same leading dims as the scores
    Returns a float32 scalar: fn(masked_fill(g @ weight.T, ~mask, -1e6)).
    """
    if fn in ("sparsemax", "normmax", "entmax"):
        # TODO(synk): iterative sparsemax/normmax/entmax projections not ported.
        raise NotImplementedError(fn)
    if fn not in ("relu", "softmax", "tanh"):
        raise ValueError(f"unknown energy fn {fn!r}")

    in_dim = g.shape[-1]
    out_dim = weight.shape[0]
    m_rows = math.prod(g.shape[:-1]) if g.ndim > 1 else 1

    g2 = g.reshape(m_rows, in_dim).astype(jnp.float32)
    w = jnp.transpose(weight).astype(jnp.float32)          # (in_dim, out_dim)
    m2 = mask.reshape(m_rows, out_dim).astype(jnp.int8)    # 1 byte/elem in HBM

    tile_m = _pick_tile_m(m_rows, in_dim, out_dim)
    n_tiles = pl.cdiv(m_rows, tile_m)
    need_row_mask = (m_rows % tile_m) != 0

    kernel = functools.partial(
        _hopfield_energy_kernel, fn_name=fn, total_rows=m_rows,
        tile_m=tile_m, need_row_mask=need_row_mask)

    partials = pl.pallas_call(
        kernel,
        out_shape=jax.ShapeDtypeStruct((n_tiles, 1, 1), jnp.float32),
        grid_spec=pltpu.PrefetchScalarGridSpec(
            num_scalar_prefetch=0,
            grid=(n_tiles,),
            in_specs=[
                pl.BlockSpec((tile_m, in_dim), lambda i: (i, 0)),   # g rows
                pl.BlockSpec((in_dim, out_dim), lambda i: (0, 0)),  # weight (resident)
                pl.BlockSpec((tile_m, out_dim), lambda i: (i, 0)),  # mask rows
            ],
            out_specs=pl.BlockSpec((1, 1, 1), lambda i: (i, 0, 0)),  # per-tile partial
        ),
        compiler_params=pltpu.CompilerParams(
            # Disjoint output blocks -> row-tile axis is data-parallel (megacore on v7x).
            dimension_semantics=("parallel",),
            vmem_limit_bytes=48 * 1024 * 1024,
        ),
        cost_estimate=pl.CostEstimate(
            flops=2 * m_rows * in_dim * out_dim,
            transcendentals=0 if fn == "relu" else m_rows * out_dim,
            bytes_accessed=4 * m_rows * in_dim + 4 * in_dim * out_dim
                           + m_rows * out_dim + 4 * n_tiles,
        ),
    )(g2, w, m2)

    return jnp.sum(partials)


if __name__ == "__main__":
    key = jax.random.PRNGKey(0)
    kg, kw, km = jax.random.split(key, 3)

    # Hopfield(in_dim=32, multiplier=4.0, fn='relu', bias=False)
    batch, seq, in_dim = 2, 8, 32
    multiplier = 4.0
    out_dim = int(in_dim * multiplier)

    g = jax.random.normal(kg, (batch, seq, in_dim), dtype=jnp.float32)
    bound = 1.0 / math.sqrt(in_dim)  # nn.Linear default init range
    weight = jax.random.uniform(kw, (out_dim, in_dim), dtype=jnp.float32,
                                minval=-bound, maxval=bound)
    mask = jax.random.bernoulli(km, 0.75, (batch, seq, out_dim))

    out = hopfield_forward(g, weight, mask, fn="relu")
    out = jax.block_until_ready(out)

    # Pure-JAX reference of the PyTorch forward.
    scores = jnp.einsum("bsi,oi->bso", g, weight)
    scores = jnp.where(mask, scores, _NEG_FILL)
    ref = -0.5 * jnp.sum(jnp.maximum(scores, 0.0) ** 2)

    assert out.shape == () and out.dtype == jnp.float32
    rel_err = jnp.abs(out - ref) / (jnp.abs(ref) + 1e-6)
    assert rel_err < 2e-4, (out, ref, rel_err)

    print("KERNEL_OK")
</pallas_src>

<mosaic_0001>
module attributes {stable_mosaic.version = 11 : i64} {
  func.func @_hopfield_energy_kernel(%arg0: i32, %arg1: memref<16x32xf32, #tpu.memory_space<vmem>>, %arg2: memref<32x128xf32, #tpu.memory_space<vmem>>, %arg3: memref<16x128xi8, #tpu.memory_space<vmem>>, %arg4: memref<1x1x1xf32, #tpu.memory_space<vmem>>) attributes {dimension_semantics = [#tpu.dimension_semantics<parallel>], iteration_bounds = array<i64: 1>, scalar_prefetch = 0 : i64, scratch_operands = 0 : i64, tpu.core_type = #tpu.core_type<tc>, window_params = [{transform_indices = @transform_0, window_bounds = array<i64: 16, 32>}, {pipeline_mode = #tpu.pipeline_mode<synchronous>, transform_indices = @transform_1, window_bounds = array<i64: 32, 128>}, {transform_indices = @transform_2, window_bounds = array<i64: 16, 128>}, {transform_indices = @transform_3, window_bounds = array<i64: 1, 1, 1>}]} {
    %c0 = arith.constant 0 : index
    %c0_0 = arith.constant 0 : index
    %0 = vector.load %arg1[%c0, %c0_0] : memref<16x32xf32, #tpu.memory_space<vmem>>, vector<16x32xf32>
    %c0_1 = arith.constant 0 : index
    %c0_2 = arith.constant 0 : index
    %1 = vector.load %arg2[%c0_1, %c0_2] : memref<32x128xf32, #tpu.memory_space<vmem>>, vector<32x128xf32>
    %cst = arith.constant dense<0.000000e+00> : vector<16x128xf32>
    %2 = tpu.matmul %0, %1, %cst {dimension_numbers = #tpu.dot_dimension_numbers<[1], [0], [0], [1], [0, 0, 1, 1], [], []>} : vector<16x32xf32>, vector<32x128xf32>, vector<16x128xf32> -> vector<16x128xf32>
    %c0_3 = arith.constant 0 : index
    %c0_4 = arith.constant 0 : index
    %3 = vector.load %arg3[%c0_3, %c0_4] : memref<16x128xi8, #tpu.memory_space<vmem>>, vector<16x128xi8>
    %c0_i8 = arith.constant 0 : i8
    %4 = vector.broadcast %c0_i8 : i8 to vector<16x128xi8>
    %5 = arith.cmpi ne, %3, %4 : vector<16x128xi8>
    %cst_5 = arith.constant -1.000000e+06 : f32
    %6 = vector.broadcast %cst_5 : f32 to vector<16x128xf32>
    %7 = arith.select %5, %2, %6 : vector<16x128xi1>, vector<16x128xf32>
    %cst_6 = arith.constant 0.000000e+00 : f32
    %8 = vector.broadcast %cst_6 : f32 to vector<16x128xf32>
    %9 = arith.maximumf %7, %8 : vector<16x128xf32>
    %10 = arith.mulf %9, %9 : vector<16x128xf32>
    %cst_7 = arith.constant dense<0.000000e+00> : vector<16xf32>
    %11 = vector.multi_reduction <add>, %10, %cst_7 [1] : vector<16x128xf32> to vector<16xf32>
    %12 = vector.shape_cast %11 : vector<16xf32> to vector<16x1xf32>
    %cst_8 = arith.constant -5.000000e-01 : f32
    %13 = vector.broadcast %cst_8 : f32 to vector<16x1xf32>
    %14 = arith.mulf %13, %12 : vector<16x1xf32>
    %15 = vector.shape_cast %14 : vector<16x1xf32> to vector<1x16x1xf32>
    %cst_9 = arith.constant dense<0.000000e+00> : vector<1xf32>
    %16 = vector.multi_reduction <add>, %15, %cst_9 [1, 2] : vector<1x16x1xf32> to vector<1xf32>
    %17 = vector.shape_cast %16 : vector<1xf32> to vector<1x1x1xf32>
    %18 = vector.extract %17[0, 0, 0] : f32 from vector<1x1x1xf32>
    %19 = vector.broadcast %18 : f32 to vector<1x1x1xf32>
    %c0_10 = arith.constant 0 : index
    %c0_11 = arith.constant 0 : index
    %c0_12 = arith.constant 0 : index
    %20 = vector.load %arg4[%c0_10, %c0_11, %c0_12] : memref<1x1x1xf32, #tpu.memory_space<vmem>>, vector<1x1x1xf32>
    tpu.vector_store %arg4[%c0_10, %c0_11, %c0_12], %19 {strides = array<i32>} : memref<1x1x1xf32, #tpu.memory_space<vmem>>, vector<1x1x1xf32>,
    return
  }
  func.func @transform_0(%arg0: i32) -> (i32, i32) {
    %c0_i32 = arith.constant 0 : i32
    %c0_i32_0 = arith.constant 0 : i32
    return %arg0, %c0_i32 : i32, i32
  }
  func.func @transform_1(%arg0: i32) -> (i32, i32) {
    %c0_i32 = arith.constant 0 : i32
    %c0_i32_0 = arith.constant 0 : i32
    %c0_i32_1 = arith.constant 0 : i32
    return %c0_i32, %c0_i32_0 : i32, i32
  }
  func.func @transform_2(%arg0: i32) -> (i32, i32) {
    %c0_i32 = arith.constant 0 : i32
    %c0_i32_0 = arith.constant 0 : i32
    return %arg0, %c0_i32 : i32, i32
  }
  func.func @transform_3(%arg0: i32) -> (i32, i32, i32) {
    %c0_i32 = arith.constant 0 : i32
    %c0_i32_0 = arith.constant 0 : i32
    %c0_i32_1 = arith.constant 0 : i32
    return %arg0, %c0_i32, %c0_i32_0 : i32, i32, i32
  }
}

</mosaic_0001>

<bundles_post_ra>
// kernel: tpu_custom_call.1
= control target key start
LH: loop header
LB: loop body
LE: loop exit
PB: predicated region body
PF: predicated region fallthrough
CT: control target
= control target key end

     0   :  { %8 = vsyncpa [#allocation3], 0  ;;  %s316_s0 = inlined_call_operand.hbm [shape: f32[16,32], index: 0, kind: input, shape index: {}]   ;;  %s317_s1 = inlined_call_operand.hbm [shape: f32[32,128], index: 1, kind: input, shape index: {}]   ;;  %s318_s2 = inlined_call_operand.hbm [shape: s8[16,128], index: 2, kind: input, shape index: {}]   ;;  %s319_s3 = inlined_call_operand.hbm [shape: f32[1,1,1], index: 3, kind: output, shape index: {}]  }
   0x1   :  { %9 = vsyncpa [#allocation6], 0 }
   0x2   :  { %10 = vsyncpa [#allocation4], 0  ;;  %s28_s14 = sshll.u32 %s317_s1, 4  ;;  %s275_s15 = smov [#allocation5]   ;;  %s29_s14 = int_to_ptr.hbm [resolvable:$true] %s28_s14 }
   0x3   :  { %s30_s16 = sshll.u32 %s275_s15, 4  ;;  %s15_s19 = sshll.u32 %s316_s0, 4  ;;  %s31_s16 = int_to_ptr.vmem [resolvable:$true] %s30_s16  ;;  %s16_s19 = int_to_ptr.hbm [resolvable:$true] %s15_s19 }
   0x4   :  { %s276_s20 = smov 128   ;;  %s277_s21 = smov 8  }
   0x5   :  { %36 = dma.hbm_to_vmem [thread:$0]  %s29_s14, 512, %s31_s16, [#allocation6], %s276_s20, %s276_s20, %s277_s21  }
   0x6   :  { %s278_s22 = smov [#allocation2]   ;;  %s41_s26 = sshll.u32 %s318_s2, 4  ;;  %s42_s26 = int_to_ptr.hbm [resolvable:$true] %s41_s26 }
   0x7   :  { %s17_s23 = sshll.u32 %s278_s22, 4  ;;  %s279_s1 = smov [#allocation7]   ;;  %s18_s23 = int_to_ptr.vmem [resolvable:$true] %s17_s23 }
   0x8   :  { %23 = dma.hbm_to_vmem [thread:$0]  %s16_s19, 256, %s18_s23, [#allocation3], %s276_s20, %s276_s20, %s277_s21  }
   0x9   :  { %s43_s27 = sshll.u32 %s279_s1, 4  ;;  %s280_s28 = smov 32   ;;  %s44_s27 = int_to_ptr.vmem [resolvable:$true] %s43_s27 }
   0xa   :  { %s281_s29 = smov 2  }
   0xb   :  { %49 = dma.hbm_to_vmem [thread:$0]  %s42_s26, 64, %s44_s27, [#allocation6], %s280_s28, %s280_s28, %s281_s29  }
   0xc   :  { %269 = dma.done.wait [#allocation3], 256  }
   0xd   :  { %270 = vsyncadd [#allocation3], 4294967040 }
   0xe   :  { %271 = dma.done.wait [#allocation6], 576  }
   0xf   :  { %272 = vsyncadd [#allocation6], 4294966720  ;;  %v69_v0 = vld [vmem:[#allocation5 + $0x18] sm:$0xff]  ;;  %v68_v1 = vld [vmem:[#allocation5 + $0x10] sm:$0xff]  ;;  %vm70_vm0 = vcmask 261120   ;;  %v282_v8 = vmov 0  }
  0x10   :  { %89 = vmatpush.msra.mxu0 %v69_v0  ;;  %158 = vmatpush.msra.mxu1 %v69_v0  ;;  %v67_v2 = vld [vmem:[#allocation5 + $0x8] sm:$0xff]  ;;  %v66_v3 = vld [vmem:[#allocation5] sm:$0xff]  ;;  %v64_v4 = vld [vmem:[#allocation2] sm:$0xff]  ;;  %vm122_vm5 = vcmask 7168   ;;  %s283_s0 = smov [#allocation8]   ;;  %s145_s5 = sshll.u32 %s319_s3, 4  ;;  %s146_s5 = int_to_ptr.hbm [resolvable:$true] %s145_s5 }
  0x11   :  { %v65_v5 = vld [vmem:[#allocation2 + $0x8] sm:$0xff]  ;;  %v100_v6 = vld [vmem:[#allocation7] sm:$0x3]  ;;  %v101_v7 = vld [vmem:[#allocation7 + $0x2] sm:$0x3]  ;;  %s143_s2 = sshll.u32 %s283_s0, 4  ;;  %s144_s2 = int_to_ptr.vmem [resolvable:$true] %s143_s2 }
  0x12   :  { %90 = vmatpush.msra.mxu0 %v68_v1  ;;  %159 = vmatpush.msra.mxu1 %v68_v1  ;;  %vm102_vm1 = vnez %v100_v6  ;;  %vm103_vm2 = vnez %v101_v7  ;;  %vm136_vm6 = vcmask 0  }
  0x13   :  { %v104_v9 = vsel %vm102_vm1, 16843009, %v282_v8  ;;  %v105_v10 = vsel %vm103_vm2, 16843009, %v282_v8 }
  0x14   :  { %91 = vmatpush.msra.mxu0 %v67_v2  ;;  %160 = vmatpush.msra.mxu1 %v67_v2  ;;  %v106_v11 = vunpack.c.0.s8 %v104_v9  ;;  %v107_v12 = vunpack.c.0.s8 %v105_v10 }
  0x16   :  { %92 = vmatpush.msra.mxu0 %v66_v3  ;;  %161 = vmatpush.msra.mxu1 %v66_v3  ;;  %vm108_vm3 = vcmp.ne.s32.totalorder %v106_v11, 0  ;;  %vm109_vm4 = vcmp.ne.s32.totalorder %v107_v12, 0 }
  0x17   :  { %156 = vmatmul.msk.f32.vlgmr.msra.gmra.mxu0 %vm70_vm0, %v64_v4  ;;  %157 = vmatmul.msk.f32.vlgmr.msra.gmra.mxu1 %vm70_vm0, %v65_v5 }
  0x94   :  { %v94_v13 = vpop.f32.mrf.mxu0  ;;  %v97_v14 = vpop.f32.mrf.mxu1 }
  0x95   :  { %v110_v15 = vsel %vm108_vm3, %v94_v13, -1000000.0  ;;  %v111_v17 = vsel %vm109_vm4, %v97_v14, -1000000.0 }
  0x96   :  { %v112_v16 = vmax.f32 %v110_v15, 0.0  ;;  %v113_v19 = vmax.f32 %v111_v17, 0.0 }
  0x98   :  { %v114_v18 = vmul.f32 %v112_v16, %v112_v16  ;;  %v115_v20 = vmul.f32 %v113_v19, %v113_v19 }
  0x9a   :  { %116 = vadd.xlane.f32.xlu0 %v114_v18 }
  0xa2   :  { %118 = vadd.xlane.f32.xlu0 %v115_v20 }
 0x10d   :  { %v117_v21 = vpop.xlane.xlu0 %116 }
 0x10e   :  { %v120_v22 = vmul.f32 -0.5, %v117_v21 }
 0x110   :  { %v123_v25 = vsel %vm122_vm5, %v120_v22, 0.0 }
 0x115   :  { %v119_v23 = vpop.xlane.xlu0 %118 }
 0x116   :  { %v121_v24 = vmul.f32 -0.5, %v119_v23 }
 0x118   :  { %v124_v26 = vsel %vm122_vm5, %v121_v24, 0.0 }
 0x119   :  { %v125_v27 = vadd.f32 %v124_v26, %v123_v25 }
 0x11b   :  { %126 = vadd.xlane.f32.xlu1 %v125_v27 }
 0x18e   :  { %v127_v28 = vpop.xlane.xlu1 %126 }
 0x18f   :  { %v128_v29 = vrot.slane %v127_v28, 4 }
 0x191   :  { %v129_v30 = vadd.f32 %v128_v29, %v127_v28 }
 0x193   :  { %v130_v31 = vrot.slane %v129_v30, 2 }
 0x195   :  { %v131_v32 = vadd.f32 %v130_v31, %v129_v30 }
 0x197   :  { %v132_v33 = vrot.slane %v131_v32, 1 }
 0x199   :  { %v133_v34 = vadd.f32 %v132_v33, %v131_v32 }
 0x19b   :  { %162 = vpush %v133_v34 }
 0x1cc   :  { %s163_s6 = spop %162 }
 0x1cd   :  { %v135_v35 = vstv %s163_s6 }
 0x1ce   :  { %137 = vst.msk [vmem:[#allocation8] sm:$0x1] %vm136_vm6, %v135_v35 }
 0x1cf   :  { %148 = dma.vmem_to_hbm [thread:$0]  %s144_s2, 16, %s146_s5, [#allocation4]  }
 0x1d0   :  { %273 = dma.done.wait [#allocation4], 16  }
 0x1d1   :  { %274 = vsyncadd [#allocation4], 4294967280 }
 0x1d2   :  { %153 = vsyncpa [#allocation3], 1 }
 0x1d3   :  { %154 = vsyncpa [#allocation6], 1 }
 0x1d4   :  { %155 = vsyncpa [#allocation4], 1 }

</bundles_post_ra>
